<compile_context>
chip_gen: v6e
topology: v6e:2x2x1
jax: 0.10.0
libtpu: 0.0.40
codegen_flags: <defaults>
</compile_context>

<pallas_src>
import functools

import jax
import jax.numpy as jnp
from jax.experimental import pallas as pl
from jax.experimental.pallas import tpu as pltpu


# ----------------------------------------------------------------------------
# Kernel
# ----------------------------------------------------------------------------
def _double_linear_kernel(x_ref, w1_ref, b1_ref, w2_ref, b2_ref, o_ref):
    # x_ref: (TM, IN_p); w1_ref: (IN_p, HID_p)  [already (K, N) -- no transpose]
    x = x_ref[...].astype(w1_ref.dtype)          # no-op when pre-cast in wrapper
    h = jnp.dot(x, w1_ref[...], preferred_element_type=jnp.float32)
    h = h + b1_ref[...]                          # bias add in f32
    h = jnp.maximum(h, 0.1 * h)                  # LeakyReLU(negative_slope=0.1)
    # Cast only the second dot's LHS; accumulation stays f32.
    o = jnp.dot(h.astype(w2_ref.dtype), w2_ref[...],
                preferred_element_type=jnp.float32)
    o = o + b2_ref[...]
    o_ref[...] = o.astype(o_ref.dtype)
    # TODO(synk): if bundle dumps show vld/vst spills for very large HID_p,
    # split the bias+LeakyReLU+second-dot over 128-row sub-tiles of h with an
    # unrolled lax.fori_loop instead of shrinking TM.


# ----------------------------------------------------------------------------
# Helpers
# ----------------------------------------------------------------------------
def _round_up(n, m):
    return ((n + m - 1) // m) * m


def _cdiv(a, b):
    return (a + b - 1) // b


_VMEM_TARGET = 40 * 1024 * 1024     # tile/weight budget that fits every gen
_VMEM_LIMIT_CAP = 60 * 1024 * 1024  # stay under v7x's 64 MiB physical VMEM


def _vmem_estimate(TM, IN_p, HID_p, OUT_p, mm_bytes, x_bytes, out_bytes):
    weights = (IN_p * HID_p + HID_p * OUT_p) * mm_bytes      # Buffered(1)
    biases = (HID_p + OUT_p) * 4
    x_buf = 2 * TM * IN_p * x_bytes                          # double-buffered
    o_buf = 2 * TM * OUT_p * out_bytes                       # double-buffered
    interm = TM * HID_p * 4 + TM * OUT_p * 4                 # live f32 h / o
    return weights + biases + x_buf + o_buf + interm


def _choose_tiles(B, block_m):
    # >= 2 tiles whenever the batch is worth splitting -> both v7x TensorCores
    # get work via dimension_semantics=("parallel",). Balanced tiles bound the
    # batch padding waste to < 8 rows + rounding (vs up to a full tile before).
    min_tiles = 2 if B >= 16 else 1
    n_tiles = max(min_tiles, _cdiv(B, block_m))
    TM = _round_up(_cdiv(B, n_tiles), 8)
    B_p = n_tiles * TM
    return TM, B_p


# ----------------------------------------------------------------------------
# One-time parameter preparation (hoisted out of the per-call path)
# ----------------------------------------------------------------------------
def prepare_double_linear_params(w1, b1, w2, b2, *, use_bf16_matmul=True):
    """w1: (HID, IN); b1: (HID,); w2: (OUT, HID); b2: (OUT,).

    Returns ((w1t, b1p, w2t, b2p), out_features) with weights pre-transposed
    to K-major (IN_p, HID_p)/(HID_p, OUT_p), zero-padded to lane-dense
    multiples of 128, and cast to the matmul dtype. Zero padding is exact.
    """
    HID, IN = w1.shape
    OUT = w2.shape[0]
    IN_p, HID_p, OUT_p = (_round_up(d, 128) for d in (IN, HID, OUT))
    mm_dtype = jnp.bfloat16 if use_bf16_matmul else jnp.float32
    # TODO(synk): on v6e/v7x, padding 128-wide HID_p/OUT_p up to 256 can improve
    # 2x256^2 MXU utilization for small layers -- measure before enabling.
    w1t = jnp.pad(w1.T.astype(mm_dtype), ((0, IN_p - IN), (0, HID_p - HID)))
    w2t = jnp.pad(w2.T.astype(mm_dtype), ((0, HID_p - HID), (0, OUT_p - OUT)))
    b1p = jnp.pad(b1.astype(jnp.float32), (0, HID_p - HID)).reshape(1, HID_p)
    b2p = jnp.pad(b2.astype(jnp.float32), (0, OUT_p - OUT)).reshape(1, OUT_p)
    return (w1t, b1p, w2t, b2p), OUT


# ----------------------------------------------------------------------------
# Hot path
# ----------------------------------------------------------------------------
@functools.partial(jax.jit, static_argnames=("out_features", "block_m"))
def double_linear_apply(x, w1t, b1p, w2t, b2p, *, out_features, block_m=512):
    """x: (B, IN). Semantics: LeakyReLU(x @ w1.T + b1, 0.1) @ w2.T + b2."""
    B, IN = x.shape
    IN_p, HID_p = w1t.shape
    OUT_p = w2t.shape[1]
    mm_dtype = w1t.dtype
    out_dtype = x.dtype

    mm_bytes = jnp.dtype(mm_dtype).itemsize
    x_bytes = max(mm_bytes, jnp.dtype(x.dtype).itemsize)
    out_bytes = jnp.dtype(out_dtype).itemsize

    # Shrink block_m if the VMEM estimate blows the cross-generation budget.
    bm = block_m
    while bm > 64 and _vmem_estimate(min(bm, _round_up(B, 8)), IN_p, HID_p,
                                     OUT_p, mm_bytes, x_bytes,
                                     out_bytes) > _VMEM_TARGET:
        bm //= 2
    # TODO(synk): if the (single-buffered, bf16) weights alone exceed ~8-12 MiB,
    # add a trailing "arbitrary" K grid axis over IN with an f32 scratch
    # accumulator (pl.when init/finalize) instead of keeping them resident.

    TM, B_p = _choose_tiles(B, bm)

    est = _vmem_estimate(TM, IN_p, HID_p, OUT_p, mm_bytes, x_bytes, out_bytes)
    vmem_limit = int(min(max(est * 3 // 2 + (8 << 20), 32 << 20),
                         _VMEM_LIMIT_CAP))

    # Pad/cast x only when needed; otherwise stream it as-is and cast in-kernel
    # (avoids an extra full HBM round trip of the activations).
    pad_needed = (B_p != B) or (IN_p != IN)
    if pad_needed:
        x_p = jnp.pad(x.astype(mm_dtype), ((0, B_p - B), (0, IN_p - IN)))
    else:
        x_p = x

    grid = (B_p // TM,)
    out_p = pl.pallas_call(
        _double_linear_kernel,
        out_shape=jax.ShapeDtypeStruct((B_p, OUT_p), out_dtype),
        grid=grid,
        in_specs=[
            # x: tiled over batch, default double-buffered.
            pl.BlockSpec((TM, IN_p), lambda i: (i, 0)),
            # Weights/biases never change across the grid -> single buffer.
            pl.BlockSpec((IN_p, HID_p), lambda i: (0, 0),
                         pipeline_mode=pl.Buffered(1)),
            pl.BlockSpec((1, HID_p), lambda i: (0, 0),
                         pipeline_mode=pl.Buffered(1)),
            pl.BlockSpec((HID_p, OUT_p), lambda i: (0, 0),
                         pipeline_mode=pl.Buffered(1)),
            pl.BlockSpec((1, OUT_p), lambda i: (0, 0),
                         pipeline_mode=pl.Buffered(1)),
        ],
        out_specs=pl.BlockSpec((TM, OUT_p), lambda i: (i, 0)),
        compiler_params=pltpu.CompilerParams(
            dimension_semantics=("parallel",),   # megacore sharding on v7x
            vmem_limit_bytes=vmem_limit,
        ),
    )(x_p, w1t, b1p, w2t, b2p)

    if B_p == B and OUT_p == out_features:
        return out_p
    return out_p[:B, :out_features]


def double_linear(x, w1, b1, w2, b2, *, use_bf16_matmul=True, block_m=512):
    """Convenience one-shot wrapper (prep + apply). For repeated calls,
    precompute params with prepare_double_linear_params() once."""
    (w1t, b1p, w2t, b2p), out_features = prepare_double_linear_params(
        w1, b1, w2, b2, use_bf16_matmul=use_bf16_matmul)
    return double_linear_apply(x, w1t, b1p, w2t, b2p,
                               out_features=out_features, block_m=block_m)


# ----------------------------------------------------------------------------
# Reference / init helpers
# ----------------------------------------------------------------------------
def orthogonal_init(key, shape, dtype=jnp.float32):
    """Mimics nn.init.orthogonal_ for a 2-D (rows, cols) weight."""
    rows, cols = shape
    n = max(rows, cols)
    a = jax.random.normal(key, (n, min(rows, cols)), dtype=jnp.float32)
    q, r = jnp.linalg.qr(a)
    d = jnp.sign(jnp.diag(r))
    q = q * d[None, :]
    if rows < cols:
        q = q.T
    return q[:rows, :cols].astype(dtype)


def reference(x, w1, b1, w2, b2):
    h = x @ w1.T + b1
    h = jnp.where(h > 0, h, 0.1 * h)
    return h @ w2.T + b2


def make_params(key, IN, HID, OUT):
    kw1, kb1, kw2, kb2 = jax.random.split(key, 4)
    w1 = orthogonal_init(kw1, (HID, IN))                       # reset_parameters()
    bound1 = 1.0 / jnp.sqrt(IN)
    b1 = jax.random.uniform(kb1, (HID,), minval=-bound1, maxval=bound1,
                            dtype=jnp.float32)
    bound2 = 1.0 / jnp.sqrt(HID)
    w2 = jax.random.uniform(kw2, (OUT, HID), minval=-bound2, maxval=bound2,
                            dtype=jnp.float32)
    b2 = jax.random.uniform(kb2, (OUT,), minval=-bound2, maxval=bound2,
                            dtype=jnp.float32)
    return w1, b1, w2, b2


if __name__ == "__main__":
    key = jax.random.PRNGKey(0)
    k1, k2, k3, k4 = jax.random.split(key, 4)

    # --- Case 1: small aligned-ish shapes, bf16 (default) + f32 paths -------
    B, IN, HID, OUT = 8, 32, 64, 16
    x = jax.random.normal(k1, (B, IN), dtype=jnp.float32)
    w1, b1, w2, b2 = make_params(k2, IN, HID, OUT)
    ref = reference(x, w1, b1, w2, b2)

    # bf16 MXU path (default): prepared params reused across calls.
    params_bf16, out_feats = prepare_double_linear_params(w1, b1, w2, b2)
    out_bf16 = jax.block_until_ready(
        double_linear_apply(x, *params_bf16, out_features=out_feats))
    assert out_bf16.shape == (B, OUT)
    assert jnp.allclose(out_bf16, ref, atol=2e-1, rtol=2e-1), "bf16 mismatch"

    # f32 path: tight check.
    out_f32 = jax.block_until_ready(
        double_linear(x, w1, b1, w2, b2, use_bf16_matmul=False))
    assert out_f32.shape == (B, OUT)
    assert jnp.allclose(out_f32, ref, atol=1e-5, rtol=1e-5), "f32 mismatch"

    # --- Case 2: ragged/unaligned shapes -> multi-tile grid + padding -------
    B2, IN2, HID2, OUT2 = 40, 100, 96, 50
    x2 = jax.random.normal(k3, (B2, IN2), dtype=jnp.float32)
    w1b, b1b, w2b, b2b = make_params(k4, IN2, HID2, OUT2)
    ref2 = reference(x2, w1b, b1b, w2b, b2b)

    out2 = jax.block_until_ready(
        double_linear(x2, w1b, b1b, w2b, b2b, use_bf16_matmul=False))
    assert out2.shape == (B2, OUT2)
    assert jnp.allclose(out2, ref2, atol=1e-5, rtol=1e-5), "ragged f32 mismatch"

    print("KERNEL_OK")
</pallas_src>

<mosaic_0001>
module attributes {stable_mosaic.version = 11 : i64} {
  func.func @_double_linear_kernel(%arg0: i32, %arg1: memref<8x128xbf16, #tpu.memory_space<vmem>>, %arg2: memref<128x128xbf16, #tpu.memory_space<vmem>>, %arg3: memref<1x128xf32, #tpu.memory_space<vmem>>, %arg4: memref<128x128xbf16, #tpu.memory_space<vmem>>, %arg5: memref<1x128xf32, #tpu.memory_space<vmem>>, %arg6: memref<8x128xf32, #tpu.memory_space<vmem>>) attributes {dimension_semantics = [#tpu.dimension_semantics<parallel>], iteration_bounds = array<i64: 1>, scalar_prefetch = 0 : i64, scratch_operands = 0 : i64, tpu.core_type = #tpu.core_type<tc>, window_params = [{transform_indices = @transform_0, window_bounds = array<i64: 8, 128>}, {pipeline_mode = #tpu.pipeline_mode<synchronous>, transform_indices = @transform_1, window_bounds = array<i64: 128, 128>}, {pipeline_mode = #tpu.pipeline_mode<synchronous>, transform_indices = @transform_2, window_bounds = array<i64: 1, 128>}, {pipeline_mode = #tpu.pipeline_mode<synchronous>, transform_indices = @transform_3, window_bounds = array<i64: 128, 128>}, {pipeline_mode = #tpu.pipeline_mode<synchronous>, transform_indices = @transform_4, window_bounds = array<i64: 1, 128>}, {transform_indices = @transform_5, window_bounds = array<i64: 8, 128>}]} {
    %c0 = arith.constant 0 : index
    %c0_0 = arith.constant 0 : index
    %0 = vector.load %arg1[%c0, %c0_0] : memref<8x128xbf16, #tpu.memory_space<vmem>>, vector<8x128xbf16>
    %c0_1 = arith.constant 0 : index
    %c0_2 = arith.constant 0 : index
    %1 = vector.load %arg2[%c0_1, %c0_2] : memref<128x128xbf16, #tpu.memory_space<vmem>>, vector<128x128xbf16>
    %cst = arith.constant dense<0.000000e+00> : vector<8x128xf32>
    %2 = tpu.matmul %0, %1, %cst {dimension_numbers = #tpu.dot_dimension_numbers<[1], [0], [0], [1], [0, 0, 1, 1], [], []>} : vector<8x128xbf16>, vector<128x128xbf16>, vector<8x128xf32> -> vector<8x128xf32>
    %c0_3 = arith.constant 0 : index
    %c0_4 = arith.constant 0 : index
    %3 = vector.load %arg3[%c0_3, %c0_4] : memref<1x128xf32, #tpu.memory_space<vmem>>, vector<1x128xf32>
    %4 = vector.broadcast %3 : vector<1x128xf32> to vector<8x128xf32>
    %5 = arith.addf %2, %4 : vector<8x128xf32>
    %cst_5 = arith.constant 1.000000e-01 : f32
    %6 = vector.broadcast %cst_5 : f32 to vector<8x128xf32>
    %7 = arith.mulf %6, %5 : vector<8x128xf32>
    %8 = arith.maximumf %5, %7 : vector<8x128xf32>
    %9 = arith.truncf %8 : vector<8x128xf32> to vector<8x128xbf16>
    %c0_6 = arith.constant 0 : index
    %c0_7 = arith.constant 0 : index
    %10 = vector.load %arg4[%c0_6, %c0_7] : memref<128x128xbf16, #tpu.memory_space<vmem>>, vector<128x128xbf16>
    %cst_8 = arith.constant dense<0.000000e+00> : vector<8x128xf32>
    %11 = tpu.matmul %9, %10, %cst_8 {dimension_numbers = #tpu.dot_dimension_numbers<[1], [0], [0], [1], [0, 0, 1, 1], [], []>} : vector<8x128xbf16>, vector<128x128xbf16>, vector<8x128xf32> -> vector<8x128xf32>
    %c0_9 = arith.constant 0 : index
    %c0_10 = arith.constant 0 : index
    %12 = vector.load %arg5[%c0_9, %c0_10] : memref<1x128xf32, #tpu.memory_space<vmem>>, vector<1x128xf32>
    %13 = vector.broadcast %12 : vector<1x128xf32> to vector<8x128xf32>
    %14 = arith.addf %11, %13 : vector<8x128xf32>
    %c0_11 = arith.constant 0 : index
    %c0_12 = arith.constant 0 : index
    %15 = vector.load %arg6[%c0_11, %c0_12] : memref<8x128xf32, #tpu.memory_space<vmem>>, vector<8x128xf32>
    tpu.vector_store %arg6[%c0_11, %c0_12], %14 {strides = array<i32>} : memref<8x128xf32, #tpu.memory_space<vmem>>, vector<8x128xf32>,
    return
  }
  func.func @transform_0(%arg0: i32) -> (i32, i32) {
    %c0_i32 = arith.constant 0 : i32
    %c0_i32_0 = arith.constant 0 : i32
    return %arg0, %c0_i32 : i32, i32
  }
  func.func @transform_1(%arg0: i32) -> (i32, i32) {
    %c0_i32 = arith.constant 0 : i32
    %c0_i32_0 = arith.constant 0 : i32
    %c0_i32_1 = arith.constant 0 : i32
    return %c0_i32, %c0_i32_0 : i32, i32
  }
  func.func @transform_2(%arg0: i32) -> (i32, i32) {
    %c0_i32 = arith.constant 0 : i32
    %c0_i32_0 = arith.constant 0 : i32
    %c0_i32_1 = arith.constant 0 : i32
    return %c0_i32, %c0_i32_0 : i32, i32
  }
  func.func @transform_3(%arg0: i32) -> (i32, i32) {
    %c0_i32 = arith.constant 0 : i32
    %c0_i32_0 = arith.constant 0 : i32
    %c0_i32_1 = arith.constant 0 : i32
    return %c0_i32, %c0_i32_0 : i32, i32
  }
  func.func @transform_4(%arg0: i32) -> (i32, i32) {
    %c0_i32 = arith.constant 0 : i32
    %c0_i32_0 = arith.constant 0 : i32
    %c0_i32_1 = arith.constant 0 : i32
    return %c0_i32, %c0_i32_0 : i32, i32
  }
  func.func @transform_5(%arg0: i32) -> (i32, i32) {
    %c0_i32 = arith.constant 0 : i32
    %c0_i32_0 = arith.constant 0 : i32
    return %arg0, %c0_i32 : i32, i32
  }
}

</mosaic_0001>

<bundles_post_ra>
// kernel: double_linear_apply.1
= control target key start
LH: loop header
LB: loop body
LE: loop exit
PB: predicated region body
PF: predicated region fallthrough
CT: control target
= control target key end

     0   :  { %10 = vsyncpa [#allocation3], 0  ;;  %s513_s0 = inlined_call_operand.vmem [shape: bf16[8,128], index: 0, kind: input, shape index: {}]   ;;  %s514_s1 = inlined_call_operand.hbm [shape: bf16[128,128], index: 1, kind: input, shape index: {}]   ;;  %s515_s2 = inlined_call_operand.vmem [shape: f32[1,128], index: 2, kind: input, shape index: {}]   ;;  %s516_s3 = inlined_call_operand.hbm [shape: bf16[128,128], index: 3, kind: input, shape index: {}]   ;;  %s517_s4 = inlined_call_operand.vmem [shape: f32[1,128], index: 4, kind: input, shape index: {}]   ;;  %s518_s5 = inlined_call_operand.hbm [shape: f32[8,128], index: 5, kind: output, shape index: {}]  }
   0x1   :  { %11 = vsyncpa [#allocation6], 0 }
   0x2   :  { %12 = vsyncpa [#allocation4], 0  ;;  %s458_s18 = smov [#allocation2]  }
   0x3   :  { %s20_s19 = sshll.u32 %s458_s18, 4  ;;  %s21_s19 = int_to_ptr.vmem [resolvable:$true] %s20_s19 }
   0x4   :  { %s400_s20 = scalar_lea.vmem %s21_s19, 1024  ;;  %p405_p1 = scmp.lt.s32.totalorder %s21_s19, %s21_s19 }
   0x5   :  { %p401_p0 = scmp.ne.s32.totalorder %s21_s19, %s400_s20  ;;  %p406_p2 = scmp.lt.s32.totalorder %s400_s20, %s400_s20 }
   0x7   :  { %p407_p3 = por %p406_p2, %p405_p1 }
   0x9   :  { %p408_p4 = pnand %p407_p3, %p401_p0 }
   0xb   :  { %411 = shalt.err (!%p408_p4)
}
   0xc   :  { %s459_s21 = smov 64   ;;  %s460_s22 = smov 4  }
   0xd   :  { %26 = dma.hbm_to_vmem [thread:$0]  %s514_s1, 1024, %s21_s19, [#allocation3], %s459_s21, %s459_s21, %s460_s22  }
   0xe   :  { %s461_s25 = smov [#allocation5]  }
   0xf   :  { %s34_s26 = sshll.u32 %s461_s25, 4  ;;  %s35_s26 = int_to_ptr.vmem [resolvable:$true] %s34_s26 }
  0x10   :  { %s420_s27 = scalar_lea.vmem %s35_s26, 1024  ;;  %p425_p6 = scmp.lt.s32.totalorder %s35_s26, %s35_s26 }
  0x11   :  { %p421_p5 = scmp.ne.s32.totalorder %s35_s26, %s420_s27  ;;  %p426_p7 = scmp.lt.s32.totalorder %s420_s27, %s420_s27 }
  0x13   :  { %p427_p8 = por %p426_p7, %p425_p6 }
  0x15   :  { %p428_p9 = pnand %p427_p8, %p421_p5 }
  0x17   :  { %431 = shalt.err (!%p428_p9)
}
  0x18   :  { %40 = dma.hbm_to_vmem [thread:$0]  %s516_s3, 1024, %s35_s26, [#allocation6], %s459_s21, %s459_s21, %s460_s22  }
  0x19   :  { %452 = dma.done.wait [#allocation3], 1024  }
  0x1a   :  { %453 = vsyncadd [#allocation3], 4294966272 }
  0x1b   :  { %454 = dma.done.wait [#allocation6], 1024  }
  0x1c   :  { %455 = vsyncadd [#allocation6], 4294966272  ;;  %v462_v0 = vmov 0.0   ;;  %vm463_vm0 = vmmov 0   ;;  %v376_v1 = vld [vmem:[#allocation2 + $0x38] sm:$0xff]   ;;  %v377_v2 = vld [vmem:[#allocation2 + $0x30] sm:$0xff]  }
  0x1d   :  { %329 = vmatprep.subr.bf16.mxu0 %v462_v0  ;;  %345 = vmatprep.mubr.msk.bf16.mxu0 %vm463_vm0, %v462_v0  ;;  %v378_v3 = vld [vmem:[#allocation2 + $0x28] sm:$0xff]   ;;  %v384_v4 = vld [vmem:[#allocation5 + $0x38] sm:$0xff]   ;;  %v379_v5 = vld [vmem:[#allocation2 + $0x20] sm:$0xff]   ;;  %s464_s8 = smov [#allocation7]  }
  0x1e   :  { %349 = vmatprep.subr.bf16.mxu1 %v462_v0  ;;  %365 = vmatprep.mubr.msk.bf16.mxu1 %vm463_vm0, %v462_v0  ;;  %v385_v6 = vld [vmem:[#allocation5 + $0x30] sm:$0xff]   ;;  %v380_v7 = vld [vmem:[#allocation2 + $0x18] sm:$0xff]   ;;  %v386_v8 = vld [vmem:[#allocation5 + $0x28] sm:$0xff]   ;;  %s283_s9 = sshll.u32 %s464_s8, 4  ;;  %s284_s9 = int_to_ptr.vmem [resolvable:$true] %s283_s9 }
  0x1f   :  { %330 = vmatpush3.bf16.msra.mxu0 %v376_v1  ;;  %350 = vmatpush3.bf16.msra.mxu1 %v384_v4  ;;  %v381_v9 = vld [vmem:[#allocation2 + $0x10] sm:$0xff]   ;;  %v387_v10 = vld [vmem:[#allocation5 + $0x20] sm:$0xff]   ;;  %v382_v11 = vld [vmem:[#allocation2 + $0x8] sm:$0xff]   ;;  %p437_p11 = scmp.lt.s32.totalorder %s284_s9, %s284_s9 }
  0x20   :  { %331 = vmatprep.subr.bf16.mxu0 %v462_v0  ;;  %351 = vmatprep.subr.bf16.mxu1 %v462_v0  ;;  %v388_v12 = vld [vmem:[#allocation5 + $0x18] sm:$0xff]   ;;  %v383_v13 = vld [vmem:[#allocation2] sm:$0xff]   ;;  %v389_v14 = vld [vmem:[#allocation5 + $0x10] sm:$0xff]  }
  0x21   :  { %v50_v15 = vld [vmem:[%s513_s0] sm:$0xf]  ;;  %v390_v16 = vld [vmem:[#allocation5 + $0x8] sm:$0xff]  }
  0x22   :  { %v391_v17 = vld [vmem:[#allocation5] sm:$0xff]  }
  0x23   :  { %332 = vmatpush3.bf16.msra.mxu0 %v377_v2  ;;  %352 = vmatpush3.bf16.msra.mxu1 %v385_v6  ;;  %v293_v18 = vld [vmem:[%s515_s2] ss:$0 sm:$0xff]  ;;  %s432_s2 = scalar_lea.vmem %s284_s9, 128 }
  0x24   :  { %333 = vmatprep.subr.bf16.mxu0 %v462_v0  ;;  %353 = vmatprep.subr.bf16.mxu1 %v462_v0  ;;  %v302_v27 = vld [vmem:[%s517_s4] ss:$0 sm:$0xff]  ;;  %p433_p10 = scmp.ne.s32.totalorder %s284_s9, %s432_s2  ;;  %p438_p12 = scmp.lt.s32.totalorder %s432_s2, %s432_s2 }
  0x26   :  { %p439_p13 = por %p438_p12, %p437_p11 }
  0x27   :  { %334 = vmatpush3.bf16.msra.mxu0 %v378_v3  ;;  %354 = vmatpush3.bf16.msra.mxu1 %v386_v8 }
  0x28   :  { %335 = vmatprep.subr.bf16.mxu0 %v462_v0  ;;  %355 = vmatprep.subr.bf16.mxu1 %v462_v0  ;;  %p440_p0 = pnand %p439_p13, %p433_p10 }
  0x2b   :  { %336 = vmatpush3.bf16.msra.mxu0 %v379_v5  ;;  %356 = vmatpush3.bf16.msra.mxu1 %v387_v10 }
  0x2c   :  { %337 = vmatprep.subr.bf16.mxu0 %v462_v0  ;;  %357 = vmatprep.subr.bf16.mxu1 %v462_v0 }
  0x2f   :  { %338 = vmatpush3.bf16.msra.mxu0 %v380_v7  ;;  %358 = vmatpush3.bf16.msra.mxu1 %v388_v12 }
  0x30   :  { %339 = vmatprep.subr.bf16.mxu0 %v462_v0  ;;  %359 = vmatprep.subr.bf16.mxu1 %v462_v0 }
  0x33   :  { %340 = vmatpush3.bf16.msra.mxu0 %v381_v9  ;;  %360 = vmatpush3.bf16.msra.mxu1 %v389_v14 }
  0x34   :  { %341 = vmatprep.subr.bf16.mxu0 %v462_v0  ;;  %361 = vmatprep.subr.bf16.mxu1 %v462_v0 }
  0x37   :  { %342 = vmatpush3.bf16.msra.mxu0 %v382_v11  ;;  %362 = vmatpush3.bf16.msra.mxu1 %v390_v16 }
  0x38   :  { %343 = vmatprep.subr.bf16.mxu0 %v462_v0  ;;  %363 = vmatprep.subr.bf16.mxu1 %v462_v0 }
  0x3b   :  { %344 = vmatpush3.bf16.msra.mxu0 %v383_v13  ;;  %364 = vmatpush3.bf16.msra.mxu1 %v391_v17 }
  0x3e   :  { %346 = vmatmul.mubr.bf16.vlgmr.msra.gmra.mxu0 %v50_v15 }
  0xfe   :  { %v156_v19 = vpop.f32.mrf.mxu0 }
  0xff   :  { %v157_v20 = vadd.f32 %v293_v18, %v156_v19 }
 0x100   :  { %v347_v21 = vpop.f32.mrf.mxu0 }
 0x101   :  { %v162_v22 = vmul.f32 0.1, %v157_v20 }
 0x102   :  { %v159_v23 = vpop.f32.mrf.mxu0 }
 0x103   :  { %v163_v24 = vmax.f32 %v157_v20, %v162_v22 }
 0x104   :  { %v348_v25 = vpop.f32.mrf.mxu0 }
 0x105   :  { %v164_v26 = vpack.c.bf16 %v163_v24, %v163_v24 }
 0x107   :  { %366 = vmatmul.mubr.bf16.vlgmr.msra.gmra.mxu1 %v164_v26 }
 0x1c7   :  { %v270_v28 = vpop.f32.mrf.mxu1 }
 0x1c8   :  { %v271_v29 = vadd.f32 %v302_v27, %v270_v28 }
 0x1c9   :  { %v367_v30 = vpop.f32.mrf.mxu1 }
 0x1ca   :  { %276 = vst [vmem:[#allocation7] sm:$0xff] %v271_v29 }
 0x1cb   :  { %v273_v31 = vpop.f32.mrf.mxu1 }
 0x1cc   :  { %443 = shalt.err (!%p440_p0)
}
 0x1cd   :  { %286 = dma.vmem_to_hbm [thread:$0]  %s284_s9, 128, %s518_s5, [#allocation4]   ;;  %v368_v32 = vpop.f32.mrf.mxu1 }
 0x1ce   :  { %456 = dma.done.wait [#allocation4], 128  }
 0x1cf   :  { %457 = vsyncadd [#allocation4], 4294967168 }
 0x1d0   :  { %290 = vsyncpa [#allocation3], 1 }
 0x1d1   :  { %291 = vsyncpa [#allocation6], 1 }
 0x1d2   :  { %292 = vsyncpa [#allocation4], 1 }

</bundles_post_ra>
